<compile_context>
chip_gen: v6e
topology: v6e:2x2x1
jax: 0.10.0
libtpu: 0.0.40
codegen_flags: <defaults>
</compile_context>

<pallas_src>
import functools

import jax
import jax.numpy as jnp
from jax.experimental import pallas as pl
from jax.experimental.pallas import tpu as pltpu


# -----------------------------------------------------------------------------------
# Kernel 1: backbone hot path — Conv3x3(pad=1) as im2col matmul -> bias -> ReLU ->
# global-average-pool, accumulated across a spatial (HW) grid axis.
# -----------------------------------------------------------------------------------
def conv_gap_kernel(patch_ref, wconv_ref, bconv_ref, out_ref, *, inv_hw):
    # patch_ref: [1, HWt, Kc]  bf16  (im2col patches, one HW tile of one image)
    # wconv_ref: [Kc, Fpad]    bf16  (conv weights; out-channels zero-padded to lane)
    # bconv_ref: [1, Fpad]     f32
    # out_ref:   [1, 1, Fpad]  f32   (pooled features; resident across the HW axis)
    h = pl.program_id(1)

    @pl.when(h == 0)
    def _init():
        out_ref[...] = jnp.zeros_like(out_ref)

    # Conv as a single MXU matmul per tile (K = Kc; Mosaic pads K internally — there
    # is no HBM-side zero padding of the contraction axis).
    acc = jnp.dot(patch_ref[0], wconv_ref[...],
                  preferred_element_type=jnp.float32)            # [HWt, Fpad] f32
    acc = jnp.maximum(acc + bconv_ref[...], 0.0)                 # conv bias + ReLU
    out_ref[0] += jnp.sum(acc, axis=0, keepdims=True)            # partial spatial sum

    @pl.when(h == pl.num_programs(1) - 1)
    def _finalize():
        out_ref[...] = out_ref[...] * inv_hw                     # GAP: sum -> mean


# -----------------------------------------------------------------------------------
# Kernel 2: the module's fc Linear, hoisted out of the per-image loop and run ONCE as
# a batched [B, Fpad] @ [Fpad, Tpad] matmul (lane-dense, unmasked output store).
# -----------------------------------------------------------------------------------
def fc_kernel(feat_ref, wfc_ref, bfc_ref, out_ref):
    out_ref[...] = jnp.dot(feat_ref[...], wfc_ref[...],
                           preferred_element_type=jnp.float32) + bfc_ref[...]


def _pick_hw_tile(hw, max_rows=2048):
    """Largest divisor of hw that is a multiple of 8, <= max_rows, and (when possible)
    leaves >= 2 HW tiles so each TensorCore runs a multi-step, double-buffered
    pipeline even when the batch axis alone cannot feed both v7x cores."""
    divs = [d for d in range(8, min(hw, max_rows) + 1, 8) if hw % d == 0]
    if not divs:
        return hw                       # tiny / odd spatial size: take the full extent
    multi = [d for d in divs if hw // d >= 2]
    return max(multi) if multi else max(divs)


def cnn_forward(x_nchw, w_conv, b_conv, w_fc, b_fc, *, lane=128, max_rows_per_tile=2048):
    """x_nchw: [B, C, H, W] f32 (PyTorch layout). w_conv: [KH, KW, C, F].
    w_fc: [F, T] (= transposed PyTorch nn.Linear weight). Returns [B, T] f32."""
    B, C, H, W = x_nchw.shape
    KH, KW, _, F = w_conv.shape
    T = w_fc.shape[1]
    HW = H * W
    Kc = KH * KW * C
    rup = lambda n: ((n + lane - 1) // lane) * lane
    # NOTE: on v6e/v7x (256-wide MXU) round Fpad/Tpad up to 256 once F > 128; F is
    # small here so 128 keeps padding minimal (v5e-native width).
    Fpad, Tpad = rup(F), rup(T)
    hw_tile = _pick_hw_tile(HW, max_rows_per_tile)
    n_hw = HW // hw_tile

    # --- Glue (plain JAX): layout + im2col. Contraction axis NOT padded in HBM;
    #     patches are streamed as bf16.
    # TODO(synk): for large images, fuse the im2col into the kernel (DMA the padded
    # NHWC image with halo'd blocks and build the 9 taps in VMEM) to remove the
    # remaining ~2.25x HBM inflation of this materialized patch tensor.
    x_nhwc = jnp.transpose(x_nchw, (0, 2, 3, 1))                       # [B, H, W, C]
    x_pad = jnp.pad(x_nhwc, ((0, 0), (1, 1), (1, 1), (0, 0)))          # stride=1, pad=1
    taps = [x_pad[:, kh:kh + H, kw:kw + W, :]
            for kh in range(KH) for kw in range(KW)]                   # 9 x [B,H,W,C]
    patches = jnp.stack(taps, axis=3).reshape(B, HW, Kc)               # [B, HW, Kc]
    patches = patches.astype(jnp.bfloat16)

    # Weight / bias packing. Only OUTPUT widths are zero-padded to lane-dense widths
    # (exact no-ops: padded conv channels stay 0 through ReLU/GAP; padded fc rows/cols
    # contribute 0). The conv contraction axis stays at Kc.
    wconv_mat = w_conv.reshape(Kc, F)
    wconv_mat = jnp.pad(wconv_mat, ((0, 0), (0, Fpad - F))).astype(jnp.bfloat16)
    bconv_row = jnp.pad(b_conv.reshape(1, F), ((0, 0), (0, Fpad - F)))
    wfc_mat = jnp.pad(w_fc, ((0, Fpad - F), (0, Tpad - T)))            # fc kept f32
    bfc_row = jnp.pad(b_fc.reshape(1, T), ((0, 0), (0, Tpad - T)))

    # --- Kernel 1: conv + ReLU + GAP. Batch axis "parallel" (v7x megacore), HW axis
    #     "arbitrary" (accumulation). wconv/bconv block indices never change, so they
    #     are fetched once; at realistic F they would additionally get
    #     pipeline_mode=pl.Buffered(1) (or a scratch load-once) to drop the spare
    #     double buffer and free VMEM for the patch pipeline.
    conv_cost = pl.CostEstimate(
        flops=2 * B * HW * Kc * Fpad + 3 * B * HW * Fpad,
        transcendentals=0,
        bytes_accessed=B * HW * Kc * 2 + Kc * Fpad * 2 + Fpad * 4 + B * Fpad * 4)
    pooled = pl.pallas_call(
        functools.partial(conv_gap_kernel, inv_hw=1.0 / HW),
        out_shape=jax.ShapeDtypeStruct((B, 1, Fpad), jnp.float32),
        grid_spec=pltpu.PrefetchScalarGridSpec(
            num_scalar_prefetch=0,
            grid=(B, n_hw),
            in_specs=[
                pl.BlockSpec((1, hw_tile, Kc), lambda b, h: (b, h, 0)),   # patch stream
                pl.BlockSpec((Kc, Fpad), lambda b, h: (0, 0)),            # conv weight
                pl.BlockSpec((1, Fpad), lambda b, h: (0, 0)),             # conv bias
            ],
            out_specs=pl.BlockSpec((1, 1, Fpad), lambda b, h: (b, 0, 0)),
        ),
        compiler_params=pltpu.CompilerParams(
            dimension_semantics=("parallel", "arbitrary")),
        cost_estimate=conv_cost,
    )(patches, wconv_mat, bconv_row)

    # --- Kernel 2: fc Linear over the WHOLE batch in a single MXU pass.
    fc_cost = pl.CostEstimate(
        flops=2 * B * Fpad * Tpad,
        transcendentals=0,
        bytes_accessed=B * Fpad * 4 + Fpad * Tpad * 4 + Tpad * 4 + B * Tpad * 4)
    logits = pl.pallas_call(
        fc_kernel,
        out_shape=jax.ShapeDtypeStruct((B, Tpad), jnp.float32),
        grid_spec=pltpu.PrefetchScalarGridSpec(
            num_scalar_prefetch=0,
            grid=(1,),
            in_specs=[
                pl.BlockSpec((B, Fpad), lambda i: (0, 0)),
                pl.BlockSpec((Fpad, Tpad), lambda i: (0, 0)),
                pl.BlockSpec((1, Tpad), lambda i: (0, 0)),
            ],
            out_specs=pl.BlockSpec((B, Tpad), lambda i: (0, 0)),
        ),
        compiler_params=pltpu.CompilerParams(dimension_semantics=("arbitrary",)),
        cost_estimate=fc_cost,
    )(pooled.reshape(B, Fpad), wfc_mat, bfc_row)

    return logits[:, :T]


if __name__ == "__main__":
    # Small deterministic shapes consistent with the module's forward.
    B, C, H, W = 2, 4, 16, 16     # input image batch (NCHW)
    F = 32                        # n_features (backbone output width)
    T = 10                        # cfg.target_size
    KH = KW = 3

    key = jax.random.PRNGKey(0)
    k_x, k_wc, k_bc, k_wf, k_bf = jax.random.split(key, 5)
    x = jax.random.normal(k_x, (B, C, H, W), jnp.float32)
    w_conv = jax.random.normal(k_wc, (KH, KW, C, F), jnp.float32) * 0.1
    b_conv = jax.random.normal(k_bc, (F,), jnp.float32) * 0.1
    w_fc = jax.random.normal(k_wf, (F, T), jnp.float32) * 0.1   # stored as [in, out]
    b_fc = jax.random.normal(k_bf, (T,), jnp.float32) * 0.1

    out = cnn_forward(x, w_conv, b_conv, w_fc, b_fc)
    out = jax.block_until_ready(out)
    assert out.shape == (B, T) and out.dtype == jnp.float32

    # Reference check (plain XLA): Conv3x3(SAME) -> ReLU -> GAP -> Linear.
    fmap = jax.lax.conv_general_dilated(
        x, w_conv, window_strides=(1, 1), padding="SAME",
        dimension_numbers=("NCHW", "HWIO", "NCHW"))              # [B, F, H, W]
    fmap = jnp.maximum(fmap + b_conv[None, :, None, None], 0.0)
    ref = jnp.mean(fmap, axis=(2, 3)) @ w_fc + b_fc              # [B, T]
    err = float(jnp.max(jnp.abs(out - ref)))
    assert err < 5e-2, f"max |err| = {err}"

    print("KERNEL_OK")
</pallas_src>

<mosaic_0001>
module attributes {stable_mosaic.version = 11 : i64} {
  func.func @conv_gap_kernel(%arg0: i32, %arg1: i32, %arg2: memref<1x128x36xbf16, #tpu.memory_space<vmem>>, %arg3: memref<36x128xbf16, #tpu.memory_space<vmem>>, %arg4: memref<1x128xf32, #tpu.memory_space<vmem>>, %arg5: memref<1x1x128xf32, #tpu.memory_space<vmem>>) attributes {dimension_semantics = [#tpu.dimension_semantics<parallel>, #tpu.dimension_semantics<arbitrary>], iteration_bounds = array<i64: 2, 2>, scalar_prefetch = 0 : i64, scratch_operands = 0 : i64, tpu.core_type = #tpu.core_type<tc>, window_params = [{transform_indices = @transform_0, window_bounds = array<i64: 1, 128, 36>}, {pipeline_mode = #tpu.pipeline_mode<synchronous>, transform_indices = @transform_1, window_bounds = array<i64: 36, 128>}, {pipeline_mode = #tpu.pipeline_mode<synchronous>, transform_indices = @transform_2, window_bounds = array<i64: 1, 128>}, {transform_indices = @transform_3, window_bounds = array<i64: 1, 1, 128>}]} {
    %c0_i32 = arith.constant 0 : i32
    %0 = arith.cmpi eq, %arg1, %c0_i32 : i32
    %1 = arith.extui %0 : i1 to i32
    %c0_i32_0 = arith.constant 0 : i32
    %2 = arith.cmpi ne, %1, %c0_i32_0 : i32
    scf.if %2 {
      %cst_16 = arith.constant 0.000000e+00 : f32
      %23 = vector.broadcast %cst_16 : f32 to vector<1x1x128xf32>
      %c0_17 = arith.constant 0 : index
      %c0_18 = arith.constant 0 : index
      %c0_19 = arith.constant 0 : index
      %24 = vector.load %arg5[%c0_17, %c0_18, %c0_19] : memref<1x1x128xf32, #tpu.memory_space<vmem>>, vector<1x1x128xf32>
      tpu.vector_store %arg5[%c0_17, %c0_18, %c0_19], %23 {strides = array<i32>} : memref<1x1x128xf32, #tpu.memory_space<vmem>>, vector<1x1x128xf32>,
    } else {
    }
    %c0 = arith.constant 0 : index
    %c0_1 = arith.constant 0 : index
    %c0_2 = arith.constant 0 : index
    %3 = vector.load %arg2[%c0, %c0_1, %c0_2] : memref<1x128x36xbf16, #tpu.memory_space<vmem>>, vector<1x128x36xbf16>
    %4 = vector.shape_cast %3 : vector<1x128x36xbf16> to vector<128x36xbf16>
    %c0_3 = arith.constant 0 : index
    %c0_4 = arith.constant 0 : index
    %5 = vector.load %arg3[%c0_3, %c0_4] : memref<36x128xbf16, #tpu.memory_space<vmem>>, vector<36x128xbf16>
    %cst = arith.constant dense<0.000000e+00> : vector<128x128xf32>
    %6 = tpu.matmul %4, %5, %cst {dimension_numbers = #tpu.dot_dimension_numbers<[1], [0], [0], [1], [0, 0, 1, 1], [], []>} : vector<128x36xbf16>, vector<36x128xbf16>, vector<128x128xf32> -> vector<128x128xf32>
    %c0_5 = arith.constant 0 : index
    %c0_6 = arith.constant 0 : index
    %7 = vector.load %arg4[%c0_5, %c0_6] : memref<1x128xf32, #tpu.memory_space<vmem>>, vector<1x128xf32>
    %8 = vector.broadcast %7 : vector<1x128xf32> to vector<128x128xf32>
    %9 = arith.addf %6, %8 : vector<128x128xf32>
    %cst_7 = arith.constant 0.000000e+00 : f32
    %10 = vector.broadcast %cst_7 : f32 to vector<128x128xf32>
    %11 = arith.maximumf %9, %10 : vector<128x128xf32>
    %c0_8 = arith.constant 0 : index
    %c0_9 = arith.constant 0 : index
    %c0_10 = arith.constant 0 : index
    %12 = vector.load %arg5[%c0_8, %c0_9, %c0_10] : memref<1x1x128xf32, #tpu.memory_space<vmem>>, vector<1x1x128xf32>
    %13 = vector.shape_cast %12 : vector<1x1x128xf32> to vector<1x128xf32>
    %cst_11 = arith.constant dense<0.000000e+00> : vector<128xf32>
    %14 = vector.multi_reduction <add>, %11, %cst_11 [0] : vector<128x128xf32> to vector<128xf32>
    %15 = vector.shape_cast %14 : vector<128xf32> to vector<1x128xf32>
    %16 = arith.addf %13, %15 : vector<1x128xf32>
    %c0_12 = arith.constant 0 : index
    %c0_13 = arith.constant 0 : index
    %c0_14 = arith.constant 0 : index
    %17 = vector.load %arg5[%c0_12, %c0_13, %c0_14] : memref<1x1x128xf32, #tpu.memory_space<vmem>>, vector<1x1x128xf32>
    %18 = vector.shape_cast %17 : vector<1x1x128xf32> to vector<1x128xf32>
    %19 = vector.shape_cast %16 : vector<1x128xf32> to vector<1x1x128xf32>
    tpu.vector_store %arg5[%c0_12, %c0_13, %c0_14], %19 {strides = array<i32>} : memref<1x1x128xf32, #tpu.memory_space<vmem>>, vector<1x1x128xf32>,
    %c1_i32 = arith.constant 1 : i32
    %20 = arith.cmpi eq, %arg1, %c1_i32 : i32
    %21 = arith.extui %20 : i1 to i32
    %c0_i32_15 = arith.constant 0 : i32
    %22 = arith.cmpi ne, %21, %c0_i32_15 : i32
    scf.if %22 {
      %c0_16 = arith.constant 0 : index
      %c0_17 = arith.constant 0 : index
      %c0_18 = arith.constant 0 : index
      %23 = vector.load %arg5[%c0_16, %c0_17, %c0_18] : memref<1x1x128xf32, #tpu.memory_space<vmem>>, vector<1x1x128xf32>
      %cst_19 = arith.constant 3.906250e-03 : f32
      %24 = vector.broadcast %cst_19 : f32 to vector<1x1x128xf32>
      %25 = arith.mulf %23, %24 : vector<1x1x128xf32>
      %c0_20 = arith.constant 0 : index
      %c0_21 = arith.constant 0 : index
      %c0_22 = arith.constant 0 : index
      %26 = vector.load %arg5[%c0_20, %c0_21, %c0_22] : memref<1x1x128xf32, #tpu.memory_space<vmem>>, vector<1x1x128xf32>
      tpu.vector_store %arg5[%c0_20, %c0_21, %c0_22], %25 {strides = array<i32>} : memref<1x1x128xf32, #tpu.memory_space<vmem>>, vector<1x1x128xf32>,
    } else {
    }
    return
  }
  func.func @transform_0(%arg0: i32, %arg1: i32) -> (i32, i32, i32) {
    %c0_i32 = arith.constant 0 : i32
    %c0_i32_0 = arith.constant 0 : i32
    return %arg0, %arg1, %c0_i32 : i32, i32, i32
  }
  func.func @transform_1(%arg0: i32, %arg1: i32) -> (i32, i32) {
    %c0_i32 = arith.constant 0 : i32
    %c0_i32_0 = arith.constant 0 : i32
    %c0_i32_1 = arith.constant 0 : i32
    return %c0_i32, %c0_i32_0 : i32, i32
  }
  func.func @transform_2(%arg0: i32, %arg1: i32) -> (i32, i32) {
    %c0_i32 = arith.constant 0 : i32
    %c0_i32_0 = arith.constant 0 : i32
    %c0_i32_1 = arith.constant 0 : i32
    return %c0_i32, %c0_i32_0 : i32, i32
  }
  func.func @transform_3(%arg0: i32, %arg1: i32) -> (i32, i32, i32) {
    %c0_i32 = arith.constant 0 : i32
    %c0_i32_0 = arith.constant 0 : i32
    %c0_i32_1 = arith.constant 0 : i32
    return %arg0, %c0_i32, %c0_i32_0 : i32, i32, i32
  }
}

</mosaic_0001>

<bundles_post_ra>
// kernel: tpu_custom_call.1
= control target key start
LH: loop header
LB: loop body
LE: loop exit
PB: predicated region body
PF: predicated region fallthrough
CT: control target
= control target key end

     0   :  { %8 = vsyncpa [#allocation3], 0  ;;  %s980_s0 = inlined_call_operand.vmem [shape: bf16[2,256,36], index: 0, kind: input, shape index: {}]   ;;  %s981_s1 = inlined_call_operand.vmem [shape: bf16[36,128], index: 1, kind: input, shape index: {}]   ;;  %s982_s2 = inlined_call_operand.vmem [shape: f32[1,128], index: 2, kind: input, shape index: {}]   ;;  %s983_s3 = inlined_call_operand.hbm [shape: f32[2,1,128], index: 3, kind: output, shape index: {}]  }
   0x1   :  { %10 = vsyncpa [#allocation3 + $0x1], 0  ;;  %s816_s12 = smov 0   ;;  %s818_s13 = smov 0  }
   0x2   :  { %s820_s14 = smov 0   ;;  %s822_s15 = smov 0  }
   0x3   :  { %s824_s16 = smov 0   ;;  %s826_s17 = smov 0  }
   0x4   :  { %s828_s18 = smov 0   ;;  %s830_s19 = smov 0  }
   0x5 LB: > { %s543_s20 = sadd.s32 4294967295, %s792_s19   ;;  %s544_s21 = sadd.s32 4294967294, %s792_s19   ;;  %s792_s19 = sphi %s830_s19, %s16_s19   ;;  %s788_s18 = sphi %s828_s18, %s992_s18   ;;  %s784_s17 = sphi %s826_s17, %s991_s17   ;;  %s780_s16 = sphi %s824_s16, %s990_s16   ;;  %s776_s15 = sphi %s822_s15, %s989_s15   ;;  %s772_s14 = sphi %s820_s14, %s988_s14   ;;  %s768_s13 = sphi %s818_s13, %s987_s13   ;;  %s764_s12 = sphi %s816_s12, %s986_s12  }
   0x6   : > { %s25_s22 = sadd.s32 1, %s784_s17  ;;  %s28_s23 = sadd.s32 1, %s788_s18 }
   0x7   : > { %p26_p0 = scmp.ge.s32.totalorder %s25_s22, 2  ;;  %p115_p1 = scmp.ne.s32.totalorder %s772_s14, %s768_s13 }
   0x8   : > { %p116_p2 = scmp.eq.s32.totalorder %s543_s20, 3  ;;  %p121_p4 = scmp.ne.s32.totalorder %s768_s13, %s764_s12 }
   0x9   : > { %s994_s22 = smov (%p26_p0, %s25_s22), 0  ;;  %s996_s23 = smov (!%p26_p0, %s28_s23), %s788_s18 }
   0xa   : > { %p865_p3 = por %p116_p2, %p115_p1  ;;  %p30_p5 = scmp.ge.s32.totalorder %s996_s23, 2 }
   0xb   : > { %p122_p6 = scmp.eq.s32.totalorder %s544_s21, 3  ;;  %p547_p7 = scmp.ge.s32.totalorder %s792_s19, 1 }
   0xc   : > { %p159_p8 = scmp.lt.s32.totalorder %s792_s19, 5  ;;  %s998_s23 = smov (%p30_p5, %s996_s23), 0 }
   0xd   : > { %p875_p9 = por %p122_p6, %p121_p4  ;;  %s102_s26 = ssub.s32 %s788_s18, %s998_s23 }
   0xe   : > { %p160_p10 = pnand %p547_p7, %p159_p8  ;;  %s105_s27 = sadd.s32 1, %s772_s14 }
   0xf   : > { %p103_p11 = scmp.eq.s32.totalorder %s102_s26, 0  ;;  %s184_s29 = sand.u32 (!%p160_p10), 1, %s768_s13  }
  0x10   : > { %163 = sbr.rel (%p160_p10) target bundleno = 323 (0x143), region = 32  ;;  %s548_s30 = sshll.u32 (!%p160_p10), %s776_s15, 4 }
  0x11   : > { %s883_s28 = scalar_select %p103_p11, %s772_s14, %s105_s27  }
  0x12   : > { %p187_p12 = scmp.lt.s32.totalorder (!%p160_p10), %s780_s16, 1  ;;  %p189_p13 = scmp.lt.s32.totalorder (!%p160_p10), %s548_s30, 31 }
  0x13   : > { %s896_s11 = scalar_lea.vmem (!%p160_p10), [#allocation2], %s184_s29  ;;  %p551_p0 = scmp.ne.s32.totalorder (!%p160_p10), %s776_s15, 0 }
  0x15   : > { %s188_s4 = scalar_select %p187_p12, %s780_s16, 1 }
  0x16   : > { %s1000_s30 = smov (!%p189_p13, %s548_s30), 31  ;;  %200 = sbr.rel (%p551_p0) target bundleno = 29 (0x1d), region = 36 }
  0x17   : > { %s549_s5 = sshll.u32 %s188_s4, 5 }
  0x18   : > { %s192_s6 = sadd.s32 %s549_s5, %s1000_s30 }
  0x19   : > { %s550_s7 = sshll.u32 %s192_s6, 2 }
  0x1a   : > { %s892_s10 = scalar_lea.vmem %s980_s0, %s550_s7 }
  0x1b   : > { %v794_v0 = vmov 0.0  }
  0x1c   : > { %201 = vst [vmem:[%s896_s11] sm:$0x1] %v794_v0 }
  0x1d PF: > { %v689_v1 = vld [vmem:[%s981_s1 + $0x10] ss:$0 sps:$4 sm:$0x33]   ;;  %vm310_vm0 = vcmask 1041408   ;;  %v690_v2 = vld [vmem:[%s981_s1 + $0x8] sm:$0xff]   ;;  %vm285_vm1 = vcmask 293888  }
  0x1e   : > { %615 = vmatprep.subr.msk.bf16.mxu0 %vm310_vm0, %v689_v1  ;;  %v312_v3 = vsel %vm310_vm0, %v689_v1, 0  ;;  %616 = vmatprep.subr.msk.bf16.mxu1 %vm310_vm0, %v689_v1  ;;  %v692_v4 = vld [vmem:[%s892_s10] sm:$0xff]   ;;  %v693_v7 = vld [vmem:[%s892_s10 + $0x8] sm:$0xff]   ;;  %v694_v9 = vld [vmem:[%s892_s10 + $0x10] sm:$0xff]   ;;  %p572_p1 = scmp.ne.s32.totalorder %s776_s15, 1 }
  0x1f   : > { %588 = vmatpush3.bf16.msra.mxu0 %v312_v3  ;;  %612 = vmatpush3.bf16.msra.mxu1 %v312_v3  ;;  %v691_v5 = vld [vmem:[%s981_s1] sm:$0xff]   ;;  %v697_v8 = vld [vmem:[%s892_s10 + $0x28] sm:$0xff]   ;;  %v698_v10 = vld [vmem:[%s892_s10 + $0x30] sm:$0xff]  }
  0x20   : > { %589 = vmatprep.subr.bf16.mxu0 %v690_v2  ;;  %610 = vmatprep.subr.bf16.mxu1 %v690_v2  ;;  %v696_v6 = vld [vmem:[%s892_s10 + $0x20] sm:$0xff]   ;;  %v695_v11 = vld [vmem:[%s892_s10 + $0x18] sm:$0xff]  }
  0x21   : > { %593 = vmatprep.mubr.msk.bf16.mxu0 %vm285_vm1, %v692_v4  ;;  %601 = vmatprep.mubr.msk.bf16.mxu1 %vm285_vm1, %v696_v6  ;;  %v699_v12 = vld [vmem:[%s892_s10 + $0x38] sm:$0xff]   ;;  %v552_v17 = vld [vmem:[%s982_s2] ss:$0 sm:$0xff] }
  0x23   : > { %590 = vmatpush3.bf16.msra.mxu0 %v690_v2  ;;  %613 = vmatpush3.bf16.msra.mxu1 %v690_v2 }
  0x24   : > { %591 = vmatprep.subr.bf16.mxu0 %v691_v5  ;;  %611 = vmatprep.subr.bf16.mxu1 %v691_v5 }
  0x27   : > { %592 = vmatpush3.bf16.msra.mxu0 %v691_v5  ;;  %614 = vmatpush3.bf16.msra.mxu1 %v691_v5 }
  0x2a   : > { %594 = vmatmul.mubr.msk.bf16.vlgmr.msra.gmra.mxu0 %vm285_vm1, %v693_v7  ;;  %602 = vmatmul.mubr.msk.bf16.vlgmr.msra.gmra.mxu1 %vm285_vm1, %v697_v8 }
  0x2b   : > { %597 = vmatprep.mubr.msk.bf16.mxu0 %vm285_vm1, %v694_v9  ;;  %605 = vmatprep.mubr.msk.bf16.mxu1 %vm285_vm1, %v698_v10 }
  0x32   : > { %598 = vmatmul.mubr.msk.bf16.gmra.mxu0 %vm285_vm1, %v695_v11  ;;  %606 = vmatmul.mubr.msk.bf16.gmra.mxu1 %vm285_vm1, %v699_v12 }
  0xea   : > { %v595_v13 = vpop.f32.mrf.mxu0  ;;  %v603_v14 = vpop.f32.mrf.mxu1 }
  0xeb   : > { %v357_v22 = vadd.f32 %v595_v13, %v552_v17  ;;  %v389_v53 = vadd.f32 %v603_v14, %v552_v17 }
  0xec   : > { %v348_v15 = vpop.f32.mrf.mxu0  ;;  %v380_v16 = vpop.f32.mrf.mxu1 }
  0xed   : > { %v349_v19 = vadd.f32 %v552_v17, %v348_v15  ;;  %v413_v30 = vmax.f32 %v357_v22, 0.0  ;;  %v381_v47 = vadd.f32 %v552_v17, %v380_v16  ;;  %v421_v60 = vmax.f32 %v389_v53, 0.0 }
  0xee   : > { %v596_v18 = vpop.f32.mrf.mxu0  ;;  %v604_v21 = vpop.f32.mrf.mxu1 }
  0xef   : > { %v411_v25 = vmax.f32 %v349_v19, 0.0  ;;  %v360_v26 = vadd.f32 %v596_v18, %v552_v17  ;;  %v419_v54 = vmax.f32 %v381_v47, 0.0  ;;  %v392_v56 = vadd.f32 %v604_v21, %v552_v17  ;;  %v427_v19 = vld [vmem:[%s896_s11] sm:$0x1] }
  0xf0   : > { %v351_v20 = vpop.f32.mrf.mxu0  ;;  %v383_v29 = vpop.f32.mrf.mxu1 }
  0xf1   : > { %v352_v23 = vadd.f32 %v552_v17, %v351_v20  ;;  %v414_v34 = vmax.f32 %v360_v26, 0.0  ;;  %v384_v51 = vadd.f32 %v552_v17, %v383_v29  ;;  %v422_v63 = vmax.f32 %v392_v56, 0.0 }
  0xf2   : > { %v599_v24 = vpop.f32.mrf.mxu0  ;;  %v607_v37 = vpop.f32.mrf.mxu1 }
  0xf3   : > { %v412_v27 = vmax.f32 %v352_v23, 0.0  ;;  %v373_v38 = vadd.f32 %v599_v24, %v552_v17  ;;  %v420_v57 = vmax.f32 %v384_v51, 0.0  ;;  %v405_v2 = vadd.f32 %v607_v37, %v552_v17 }
  0xf4   : > { %v364_v28 = vpop.f32.mrf.mxu0  ;;  %v396_v45 = vpop.f32.mrf.mxu1 }
  0xf5   : > { %v428_v31 = vadd.f32 %v412_v27, %v411_v25  ;;  %v365_v32 = vadd.f32 %v552_v17, %v364_v28  ;;  %v417_v46 = vmax.f32 %v373_v38, 0.0  ;;  %v397_v62 = vadd.f32 %v552_v17, %v396_v45 }
  0xf6   : > { %v600_v33 = vpop.f32.mrf.mxu0  ;;  %v608_v52 = vpop.f32.mrf.mxu1  ;;  %v425_v8 = vmax.f32 %v405_v2, 0.0 }
  0xf7   : > { %v429_v35 = vadd.f32 %v428_v31, %v413_v30  ;;  %v415_v39 = vmax.f32 %v365_v32, 0.0  ;;  %v376_v43 = vadd.f32 %v600_v33, %v552_v17  ;;  %v423_v3 = vmax.f32 %v397_v62, 0.0 }
  0xf8   : > { %v367_v36 = vpop.f32.mrf.mxu0  ;;  %v399_v59 = vpop.f32.mrf.mxu1  ;;  %v408_v6 = vadd.f32 %v608_v52, %v552_v17 }
  0xf9   : > { %v430_v40 = vadd.f32 %v429_v35, %v414_v34  ;;  %v368_v41 = vadd.f32 %v552_v17, %v367_v36  ;;  %v418_v49 = vmax.f32 %v376_v43, 0.0  ;;  %v400_v1 = vadd.f32 %v552_v17, %v399_v59 }
  0xfa   : > { %v426_v10 = vmax.f32 %v408_v6, 0.0 }
  0xfb   : > { %v431_v42 = vadd.f32 %v430_v40, %v415_v39  ;;  %v416_v44 = vmax.f32 %v368_v41, 0.0  ;;  %v424_v7 = vmax.f32 %v400_v1, 0.0 }
  0xfd   : > { %v432_v48 = vadd.f32 %v431_v42, %v416_v44 }
  0xff   : > { %v433_v50 = vadd.f32 %v432_v48, %v417_v46 }
 0x101   : > { %v434_v55 = vadd.f32 %v433_v50, %v418_v49 }
 0x103   : > { %v435_v58 = vadd.f32 %v434_v55, %v419_v54 }
 0x105   : > { %v436_v61 = vadd.f32 %v435_v58, %v420_v57 }
 0x107   : > { %v437_v0 = vadd.f32 %v436_v61, %v421_v60 }
 0x109   : > { %v438_v4 = vadd.f32 %v437_v0, %v422_v63 }
 0x10b   : > { %v439_v5 = vadd.f32 %v438_v4, %v423_v3 }
 0x10d   : > { %v440_v9 = vadd.f32 %v439_v5, %v424_v7 }
 0x10f   : > { %v441_v11 = vadd.f32 %v440_v9, %v425_v8 }
 0x111   : > { %v442_v12 = vadd.f32 %v441_v11, %v426_v10 }
 0x113   : > { %v443_v13 = vrot.slane %v442_v12, 4 }
 0x115   : > { %v444_v14 = vadd.f32 %v443_v13, %v442_v12 }
 0x117   : > { %v445_v15 = vrot.slane %v444_v14, 2 }
 0x119   : > { %v446_v16 = vadd.f32 %v445_v15, %v444_v14 }
 0x11b   : > { %v447_v18 = vrot.slane %v446_v16, 1 }
 0x11d   : > { %v448_v20 = vadd.f32 %v447_v18, %v446_v16  ;;  %454 = sbr.rel (%p572_p1) target bundleno = 300 (0x12c), region = 40 }
 0x11f   : > { %v449_v21 = vadd.f32 %v448_v20, %v427_v19 }
 0x121   : > { %450 = vst [vmem:[%s896_s11] sm:$0x1] %v449_v21 }
 0x128   : > { %v455_v17 = vld [vmem:[%s896_s11] sm:$0x1] }
 0x129   : > { %v456_v22 = vmul.f32 0.00390625, %v455_v17 }
 0x12b   : > { %457 = vst [vmem:[%s896_s11] sm:$0x1] %v456_v22 }
 0x12c PF: > { %s573_s7 = sshll.u32 %s780_s16, 4  ;;  %s471_s20 = sshll.u32 %s896_s11, 4  ;;  %s472_s20 = int_to_ptr.vmem [resolvable:$true] %s471_s20 }
 0x12d   : > { %s469_s10 = scalar_lea.hbm %s983_s3, %s573_s7  ;;  %s459_s15 = scalar_lea.sflag [#allocation3], %s184_s29 }
 0x12e   : > { %s700_s21 = scalar_lea.vmem %s472_s20, 16  ;;  %s795_s26 = smov [#allocation2]  }
 0x12f   : > { %p701_p2 = scmp.ne.s32.totalorder %s472_s20, %s700_s21  ;;  %s704_s27 = sshll.u32 %s795_s26, 4  ;;  %s705_s27 = int_to_ptr.vmem [resolvable:$false] %s704_s27 }
 0x130   : > { %s706_s30 = scalar_lea.vmem %s705_s27, 32  ;;  %p707_p6 = scmp.lt.s32.totalorder %s472_s20, %s705_s27 }
 0x131   : > { %p702_p4 = pnand %p701_p2, %p865_p3  ;;  %p708_p7 = scmp.lt.s32.totalorder %s706_s30, %s700_s21 }
 0x133   : > { %p703_p5 = pneg %p702_p4  ;;  %p709_p8 = por %p708_p7, %p707_p6 }
 0x135   : > { %p710_p10 = pnand %p709_p8, %p703_p5 }
 0x137   : > { %713 = shalt.err (!%p710_p10)
}
 0x138   : > { %s714_s16 = scalar_lea.hbm %s469_s10, 16  ;;  %s718_s4 = scalar_lea.hbm %s983_s3, 32 }
 0x139   : > { %p715_p11 = scmp.ne.s32.totalorder %s469_s10, %s714_s16  ;;  %p719_p0 = scmp.lt.s32.totalorder %s469_s10, %s983_s3 }
 0x13a   : > { %p720_p1 = scmp.lt.s32.totalorder %s718_s4, %s714_s16 }
 0x13b   : > { %p716_p12 = pnand %p715_p11, %p865_p3 }
 0x13c   : > { %p721_p2 = por %p720_p1, %p719_p0 }
 0x13d   : > { %p717_p13 = pneg %p716_p12 }
 0x13f   : > { %p722_p4 = pnand %p721_p2, %p717_p13 }
 0x141   : > { %725 = shalt.err (!%p722_p4)
}
 0x142   : > { %617 = dma.vmem_to_hbm [thread:$0]  (%p865_p3), %s472_s20, 16, %s469_s10, %s459_s15  }
 0x143 PF: > { %p623_p5 = scmp.ge.s32.totalorder %s792_s19, 2  ;;  %s483_s7 = sand.u32 1, %s764_s12  }
 0x144   : > { %s484_s8 = scalar_lea.sflag [#allocation3], %s483_s7 }
 0x145   : > { %p620_p6 = pnand %p623_p5, %p875_p9 }
 0x147   : > { %p621_p7 = pneg %p620_p6 }
 0x149   : > { %759 = dma.done.wait (%p621_p7), %s484_s8, 16  }
 0x14a   : > { %761 = vsyncadd (%p621_p7), %s484_s8, 4294967280  ;;  %s16_s19 = sadd.s32 1, %s792_s19   ;;  %s986_s12 = smov %s768_s13 }
 0x14b   : > { %p13_p8 = scmp.ge.s32.totalorder %s16_s19, 6   ;;  %s987_s13 = smov %s772_s14 }
 0x14c   : > { %s988_s14 = smov %s883_s28  ;;  %s989_s15 = smov %s784_s17 }
 0x14d   : > { %s990_s16 = smov %s788_s18  ;;  %s991_s17 = smov %s994_s22 }
 0x14e   : > { %s992_s18 = smov %s998_s23  ;;  %15 = sbr.rel (!%p13_p8) target bundleno = 5 (0x5), region = 75 }
 0x153   :  { %488 = vsyncpa [#allocation3], 1 }
 0x154   :  { %490 = vsyncpa [#allocation3 + $0x1], 1 }

</bundles_post_ra>
